<compile_context>
chip_gen: v5e
topology: v5e:2x2
jax: 0.10.0
libtpu: 0.0.40
codegen_flags: <defaults>
</compile_context>

<pallas_src>
import functools

import jax
import jax.numpy as jnp
import numpy as np
from jax.experimental import pallas as pl
from jax.experimental.pallas import tpu as pltpu


def sru_kernel(x_ref, w_ref, b_ref, wg_ref, p_ref, o_ref, *,
               eps, gate_threshold, half):
    # x_ref:  (BT, C, HWp)  batch tile (spatial possibly zero-padded)
    # w_ref:  (C, 1)        GroupNorm weight (gamma)
    # b_ref:  (C, 1)        GroupNorm bias (beta)
    # wg_ref: (C, 1)        precomputed w_gamma = gamma / sum(gamma)
    # p_ref:  (C, C)        group-averaging matrix (same-group mask / count)
    x = x_ref[...].astype(jnp.float32)          # (BT, C, HWp)
    w = w_ref[...]                              # (C, 1)
    b = b_ref[...]                              # (C, 1)
    wg = wg_ref[...]                            # (C, 1)
    p = p_ref[...]                              # (C, C)

    bt = x.shape[0]

    # ---- GroupNorm statistics ------------------------------------------
    # Zero padding on the spatial axis contributes 0 to both sums; p already
    # divides by the *true* element count, so stats stay exact.
    ch_sum = jnp.sum(x, axis=-1)                # (BT, C)
    ch_sumsq = jnp.sum(x * x, axis=-1)          # (BT, C)
    stats = jnp.concatenate([ch_sum, ch_sumsq], axis=0)        # (2*BT, C)

    # Single MXU dot broadcasts per-group mean / mean-square back to channels.
    g = jnp.dot(stats, p, preferred_element_type=jnp.float32)  # (2*BT, C)
    mean_c = g[:bt][:, :, None]                 # (BT, C, 1)
    msq_c = g[bt:][:, :, None]                  # (BT, C, 1)
    # TODO(synk): E[x^2]-E[x]^2 can cancel for large-mean inputs; acceptable
    # for normalized activations at these tolerances.
    var_c = jnp.maximum(msq_c - mean_c * mean_c, 0.0)
    inv_c = jax.lax.rsqrt(var_c + eps)          # (BT, C, 1)   (EUP)

    # ---- folded affine: gn = x * scale + shift (2 VALU ops on the slab) --
    scale_c = inv_c * w                         # (BT, C, 1)
    shift_c = b - mean_c * scale_c              # (BT, C, 1)
    gn = x * scale_c + shift_c                  # (BT, C, HWp)

    # ---- fused gating ----------------------------------------------------
    rw = jax.nn.sigmoid(gn * wg)                # (BT, C, HWp)
    mask = rw > gate_threshold
    rwx = rw * x
    x1 = jnp.where(mask, x, rwx)                # w1 * x
    x2 = jnp.where(mask, 0.0, rwx)              # w2 * x

    # ---- reconstruct: cross-add channel halves, store slabs directly -----
    o_ref[:, :half, :] = (x1[:, :half, :] + x2[:, half:, :]).astype(o_ref.dtype)
    o_ref[:, half:, :] = (x1[:, half:, :] + x2[:, :half, :]).astype(o_ref.dtype)


def sru_forward(x_nchw, weight, bias, *, group_num=16, gate_threshold=0.5,
                eps=1e-5, batch_tile_bytes=2 * 1024 * 1024):
    N, C, H, W = x_nchw.shape
    G = group_num
    assert C % G == 0 and C % 2 == 0
    cg = C // G
    HW = H * W

    in_dtype = x_nchw.dtype
    x = x_nchw.reshape(N, C, HW)

    # Pad spatial axis to a multiple of 128 so output stores are lane-dense.
    HWp = pl.cdiv(HW, 128) * 128
    if HWp != HW:
        x = jnp.pad(x, ((0, 0), (0, 0), (0, HWp - HW)))

    # Batch-tile so each block is ~batch_tile_bytes, while keeping the grid
    # length >= 2 when possible (megacore / dual-TC on v7x).
    itemsize = jnp.dtype(in_dtype).itemsize
    per_sample_bytes = C * HWp * itemsize
    bt = max(1, min(N, batch_tile_bytes // per_sample_bytes))
    if N >= 2:
        bt = min(bt, -(-N // 2))
    n_blocks = -(-N // bt)
    Np = n_blocks * bt
    if Np != N:
        x = jnp.pad(x, ((0, Np - N), (0, 0), (0, 0)))

    w = weight.reshape(C, 1).astype(jnp.float32)
    b = bias.reshape(C, 1).astype(jnp.float32)
    wg = w / jnp.sum(w)                                   # w_gamma, once
    # Group-averaging matrix: P[c, c'] = 1/(cg*HW) if same group else 0.
    grp = jnp.arange(C) // cg
    p = (grp[:, None] == grp[None, :]).astype(jnp.float32) / float(cg * HW)

    kernel = functools.partial(
        sru_kernel,
        eps=float(eps),
        gate_threshold=float(gate_threshold),
        half=C // 2,
    )

    block_bytes = bt * C * HWp * itemsize
    # Double-buffered in + out blocks + small constants, with headroom; cap at
    # 48 MiB so the plan also fits v7x's 64 MiB VMEM.
    vmem_limit = int(min(48 * 2**20, max(32 * 2**20, 6 * block_bytes + (2 << 20))))

    out = pl.pallas_call(
        kernel,
        out_shape=jax.ShapeDtypeStruct((Np, C, HWp), in_dtype),
        grid_spec=pltpu.PrefetchScalarGridSpec(
            num_scalar_prefetch=0,
            grid=(n_blocks,),
            in_specs=[
                pl.BlockSpec((bt, C, HWp), lambda n: (n, 0, 0)),
                pl.BlockSpec((C, 1), lambda n: (0, 0)),
                pl.BlockSpec((C, 1), lambda n: (0, 0)),
                pl.BlockSpec((C, 1), lambda n: (0, 0)),
                pl.BlockSpec((C, C), lambda n: (0, 0)),
            ],
            out_specs=pl.BlockSpec((bt, C, HWp), lambda n: (n, 0, 0)),
        ),
        compiler_params=pltpu.CompilerParams(
            dimension_semantics=("parallel",),
            vmem_limit_bytes=vmem_limit),
    )(x, w, b, wg, p)

    out = out[:N, :, :HW]
    return out.reshape(N, C, H, W)


def sru_reference(x, weight, bias, *, group_num=16, gate_threshold=0.5,
                  eps=1e-5):
    # Pure-JAX reference mirroring torch semantics (nn.GroupNorm, eps=1e-5,
    # biased variance).
    N, C, H, W = x.shape
    xr = x.reshape(N, group_num, -1)
    mean = xr.mean(axis=2, keepdims=True)
    var = xr.var(axis=2, keepdims=True)
    gn = ((xr - mean) / jnp.sqrt(var + eps)).reshape(N, C, H, W)
    gn = gn * weight.reshape(1, C, 1, 1) + bias.reshape(1, C, 1, 1)
    w_gamma = (weight / jnp.sum(weight)).reshape(1, C, 1, 1)
    rw = jax.nn.sigmoid(gn * w_gamma)
    w1 = jnp.where(rw > gate_threshold, jnp.ones_like(rw), rw)
    w2 = jnp.where(rw > gate_threshold, jnp.zeros_like(rw), rw)
    x1 = w1 * x
    x2 = w2 * x
    half = C // 2
    return jnp.concatenate(
        [x1[:, :half] + x2[:, half:], x1[:, half:] + x2[:, :half]], axis=1)


if __name__ == "__main__":
    key = jax.random.PRNGKey(0)
    k_x, k_w, k_b = jax.random.split(key, 3)

    # Small shapes consistent with the module: oup_channels=32, group_num=16.
    N, C, H, W = 2, 32, 16, 16
    group_num = 16
    gate_threshold = 0.5

    x = jax.random.normal(k_x, (N, C, H, W), dtype=jnp.float32)
    # Deterministic synthetic params (nn.GroupNorm affine: weight ~1, bias ~0).
    weight = 1.0 + 0.1 * jax.random.normal(k_w, (C,), dtype=jnp.float32)
    bias = 0.05 * jax.random.normal(k_b, (C,), dtype=jnp.float32)

    y = sru_forward(x, weight, bias, group_num=group_num,
                    gate_threshold=gate_threshold)
    y = jax.block_until_ready(y)

    y_ref = sru_reference(x, weight, bias, group_num=group_num,
                          gate_threshold=gate_threshold)
    np.testing.assert_allclose(np.asarray(y), np.asarray(y_ref),
                               rtol=1e-4, atol=1e-4)
    print("KERNEL_OK")
</pallas_src>

<mosaic_0001>
module attributes {stable_mosaic.version = 11 : i64} {
  func.func @sru_kernel(%arg0: i32, %arg1: memref<1x32x256xf32, #tpu.memory_space<vmem>>, %arg2: memref<32x1xf32, #tpu.memory_space<vmem>>, %arg3: memref<32x1xf32, #tpu.memory_space<vmem>>, %arg4: memref<32x1xf32, #tpu.memory_space<vmem>>, %arg5: memref<32x32xf32, #tpu.memory_space<vmem>>, %arg6: memref<1x32x256xf32, #tpu.memory_space<vmem>>) attributes {dimension_semantics = [#tpu.dimension_semantics<parallel>], iteration_bounds = array<i64: 2>, scalar_prefetch = 0 : i64, scratch_operands = 0 : i64, tpu.core_type = #tpu.core_type<tc>, window_params = [{transform_indices = @transform_0, window_bounds = array<i64: 1, 32, 256>}, {pipeline_mode = #tpu.pipeline_mode<synchronous>, transform_indices = @transform_1, window_bounds = array<i64: 32, 1>}, {pipeline_mode = #tpu.pipeline_mode<synchronous>, transform_indices = @transform_2, window_bounds = array<i64: 32, 1>}, {pipeline_mode = #tpu.pipeline_mode<synchronous>, transform_indices = @transform_3, window_bounds = array<i64: 32, 1>}, {pipeline_mode = #tpu.pipeline_mode<synchronous>, transform_indices = @transform_4, window_bounds = array<i64: 32, 32>}, {transform_indices = @transform_5, window_bounds = array<i64: 1, 32, 256>}]} {
    %c0 = arith.constant 0 : index
    %c0_0 = arith.constant 0 : index
    %c0_1 = arith.constant 0 : index
    %0 = vector.load %arg1[%c0, %c0_0, %c0_1] : memref<1x32x256xf32, #tpu.memory_space<vmem>>, vector<1x32x256xf32>
    %c0_2 = arith.constant 0 : index
    %c0_3 = arith.constant 0 : index
    %1 = vector.load %arg2[%c0_2, %c0_3] : memref<32x1xf32, #tpu.memory_space<vmem>>, vector<32x1xf32>
    %c0_4 = arith.constant 0 : index
    %c0_5 = arith.constant 0 : index
    %2 = vector.load %arg3[%c0_4, %c0_5] : memref<32x1xf32, #tpu.memory_space<vmem>>, vector<32x1xf32>
    %c0_6 = arith.constant 0 : index
    %c0_7 = arith.constant 0 : index
    %3 = vector.load %arg4[%c0_6, %c0_7] : memref<32x1xf32, #tpu.memory_space<vmem>>, vector<32x1xf32>
    %c0_8 = arith.constant 0 : index
    %c0_9 = arith.constant 0 : index
    %4 = vector.load %arg5[%c0_8, %c0_9] : memref<32x32xf32, #tpu.memory_space<vmem>>, vector<32x32xf32>
    %cst = arith.constant dense<0.000000e+00> : vector<1x32xf32>
    %5 = vector.multi_reduction <add>, %0, %cst [2] : vector<1x32x256xf32> to vector<1x32xf32>
    %6 = arith.mulf %0, %0 : vector<1x32x256xf32>
    %cst_10 = arith.constant dense<0.000000e+00> : vector<1x32xf32>
    %7 = vector.multi_reduction <add>, %6, %cst_10 [2] : vector<1x32x256xf32> to vector<1x32xf32>
    %8 = tpu.concatenate %5, %7 in 0 : vector<1x32xf32>, vector<1x32xf32> -> vector<2x32xf32>
    %cst_11 = arith.constant dense<0.000000e+00> : vector<2x32xf32>
    %9 = tpu.matmul %8, %4, %cst_11 {dimension_numbers = #tpu.dot_dimension_numbers<[1], [0], [0], [1], [0, 0, 1, 1], [], []>} : vector<2x32xf32>, vector<32x32xf32>, vector<2x32xf32> -> vector<2x32xf32>
    %10 = vector.extract_strided_slice %9 {offsets = [0, 0], sizes = [1, 32], strides = [1, 1]} : vector<2x32xf32> to vector<1x32xf32>
    %11 = vector.shape_cast %10 : vector<1x32xf32> to vector<1x32x1xf32>
    %12 = vector.extract_strided_slice %9 {offsets = [1, 0], sizes = [1, 32], strides = [1, 1]} : vector<2x32xf32> to vector<1x32xf32>
    %13 = vector.shape_cast %12 : vector<1x32xf32> to vector<1x32x1xf32>
    %14 = arith.mulf %11, %11 : vector<1x32x1xf32>
    %15 = arith.subf %13, %14 : vector<1x32x1xf32>
    %cst_12 = arith.constant 0.000000e+00 : f32
    %16 = vector.broadcast %cst_12 : f32 to vector<1x32x1xf32>
    %17 = arith.maximumf %15, %16 : vector<1x32x1xf32>
    %cst_13 = arith.constant 9.99999974E-6 : f32
    %18 = vector.broadcast %cst_13 : f32 to vector<1x32x1xf32>
    %19 = arith.addf %17, %18 : vector<1x32x1xf32>
    %20 = math.rsqrt %19 : vector<1x32x1xf32>
    %21 = vector.shape_cast %1 : vector<32x1xf32> to vector<1x32x1xf32>
    %22 = arith.mulf %20, %21 : vector<1x32x1xf32>
    %23 = arith.mulf %11, %22 : vector<1x32x1xf32>
    %24 = vector.shape_cast %2 : vector<32x1xf32> to vector<1x32x1xf32>
    %25 = arith.subf %24, %23 : vector<1x32x1xf32>
    %26 = vector.broadcast %22 : vector<1x32x1xf32> to vector<1x32x256xf32>
    %27 = arith.mulf %0, %26 : vector<1x32x256xf32>
    %28 = vector.broadcast %25 : vector<1x32x1xf32> to vector<1x32x256xf32>
    %29 = arith.addf %27, %28 : vector<1x32x256xf32>
    %30 = vector.shape_cast %3 : vector<32x1xf32> to vector<1x32x1xf32>
    %31 = vector.broadcast %30 : vector<1x32x1xf32> to vector<1x32x256xf32>
    %32 = arith.mulf %29, %31 : vector<1x32x256xf32>
    %33 = arith.negf %32 : vector<1x32x256xf32>
    %34 = math.exp %33 : vector<1x32x256xf32>
    %cst_14 = arith.constant 1.000000e+00 : f32
    %35 = vector.broadcast %cst_14 : f32 to vector<1x32x256xf32>
    %36 = arith.addf %35, %34 : vector<1x32x256xf32>
    %37 = arith.divf %35, %36 : vector<1x32x256xf32>
    %cst_15 = arith.constant 5.000000e-01 : f32
    %38 = vector.broadcast %cst_15 : f32 to vector<1x32x256xf32>
    %39 = arith.cmpf ogt, %37, %38 : vector<1x32x256xf32>
    %40 = arith.mulf %37, %0 : vector<1x32x256xf32>
    %41 = arith.select %39, %0, %40 : vector<1x32x256xi1>, vector<1x32x256xf32>
    %cst_16 = arith.constant 0.000000e+00 : f32
    %42 = vector.broadcast %cst_16 : f32 to vector<1x32x256xf32>
    %43 = arith.select %39, %42, %40 : vector<1x32x256xi1>, vector<1x32x256xf32>
    %44 = vector.extract_strided_slice %41 {offsets = [0, 0, 0], sizes = [1, 16, 256], strides = [1, 1, 1]} : vector<1x32x256xf32> to vector<1x16x256xf32>
    %45 = vector.extract_strided_slice %43 {offsets = [0, 16, 0], sizes = [1, 16, 256], strides = [1, 1, 1]} : vector<1x32x256xf32> to vector<1x16x256xf32>
    %46 = arith.addf %44, %45 : vector<1x16x256xf32>
    %c0_17 = arith.constant 0 : index
    %c0_18 = arith.constant 0 : index
    %c0_19 = arith.constant 0 : index
    %47 = vector.load %arg6[%c0_17, %c0_18, %c0_19] : memref<1x32x256xf32, #tpu.memory_space<vmem>>, vector<1x16x256xf32>
    tpu.vector_store %arg6[%c0_17, %c0_18, %c0_19], %46 {strides = array<i32>} : memref<1x32x256xf32, #tpu.memory_space<vmem>>, vector<1x16x256xf32>,
    %48 = vector.extract_strided_slice %41 {offsets = [0, 16, 0], sizes = [1, 16, 256], strides = [1, 1, 1]} : vector<1x32x256xf32> to vector<1x16x256xf32>
    %49 = vector.extract_strided_slice %43 {offsets = [0, 0, 0], sizes = [1, 16, 256], strides = [1, 1, 1]} : vector<1x32x256xf32> to vector<1x16x256xf32>
    %50 = arith.addf %48, %49 : vector<1x16x256xf32>
    %c0_20 = arith.constant 0 : index
    %c16 = arith.constant 16 : index
    %c0_21 = arith.constant 0 : index
    %51 = vector.load %arg6[%c0_20, %c16, %c0_21] : memref<1x32x256xf32, #tpu.memory_space<vmem>>, vector<1x16x256xf32>
    tpu.vector_store %arg6[%c0_20, %c16, %c0_21], %50 {strides = array<i32>} : memref<1x32x256xf32, #tpu.memory_space<vmem>>, vector<1x16x256xf32>,
    return
  }
  func.func @transform_0(%arg0: i32) -> (i32, i32, i32) {
    %c0_i32 = arith.constant 0 : i32
    %c0_i32_0 = arith.constant 0 : i32
    %c0_i32_1 = arith.constant 0 : i32
    return %arg0, %c0_i32, %c0_i32_0 : i32, i32, i32
  }
  func.func @transform_1(%arg0: i32) -> (i32, i32) {
    %c0_i32 = arith.constant 0 : i32
    %c0_i32_0 = arith.constant 0 : i32
    %c0_i32_1 = arith.constant 0 : i32
    return %c0_i32, %c0_i32_0 : i32, i32
  }
  func.func @transform_2(%arg0: i32) -> (i32, i32) {
    %c0_i32 = arith.constant 0 : i32
    %c0_i32_0 = arith.constant 0 : i32
    %c0_i32_1 = arith.constant 0 : i32
    return %c0_i32, %c0_i32_0 : i32, i32
  }
  func.func @transform_3(%arg0: i32) -> (i32, i32) {
    %c0_i32 = arith.constant 0 : i32
    %c0_i32_0 = arith.constant 0 : i32
    %c0_i32_1 = arith.constant 0 : i32
    return %c0_i32, %c0_i32_0 : i32, i32
  }
  func.func @transform_4(%arg0: i32) -> (i32, i32) {
    %c0_i32 = arith.constant 0 : i32
    %c0_i32_0 = arith.constant 0 : i32
    %c0_i32_1 = arith.constant 0 : i32
    return %c0_i32, %c0_i32_0 : i32, i32
  }
  func.func @transform_5(%arg0: i32) -> (i32, i32, i32) {
    %c0_i32 = arith.constant 0 : i32
    %c0_i32_0 = arith.constant 0 : i32
    %c0_i32_1 = arith.constant 0 : i32
    return %arg0, %c0_i32, %c0_i32_0 : i32, i32, i32
  }
}

</mosaic_0001>

<bundles_post_ra>
// kernel: tpu_custom_call.1
= control target key start
LH: loop header
LB: loop body
LE: loop exit
PB: predicated region body
PF: predicated region fallthrough
CT: control target
= control target key end

     0   :  { %10 = vsyncpa [#allocation3], 0  ;;  %s1508_s0 = inlined_call_operand.hbm [shape: f32[2,32,256], index: 0, kind: input, shape index: {}]   ;;  %s1509_s1 = inlined_call_operand.vmem [shape: f32[32,1], index: 1, kind: input, shape index: {}]   ;;  %s1510_s2 = inlined_call_operand.vmem [shape: f32[32,1], index: 2, kind: input, shape index: {}]   ;;  %s1511_s3 = inlined_call_operand.vmem [shape: f32[32,1], index: 3, kind: input, shape index: {}]   ;;  %s1512_s4 = inlined_call_operand.vmem [shape: f32[32,32], index: 4, kind: input, shape index: {}]   ;;  %s1513_s5 = inlined_call_operand.hbm [shape: f32[2,32,256], index: 5, kind: output, shape index: {}]  }
   0x1   :  { %12 = vsyncpa [#allocation3 + $0x1], 0 }
   0x2   :  { %13 = vsyncpa [#allocation4], 0 }
   0x3   :  { %15 = vsyncpa [#allocation4 + $0x1], 0  ;;  %s1110_s18 = smov 0   ;;  %s1112_s19 = smov 0  }
   0x4   :  { %s1114_s20 = smov 0   ;;  %s1116_s21 = smov 0  }
   0x5 LB: > { %s1131_s22 = sadd.s32 4294967295, %s1073_s21   ;;  %s850_s23 = sadd.s32 4294967294, %s1073_s21   ;;  %s1073_s21 = sphi %s1116_s21, %s1535_s21   ;;  %s1069_s20 = sphi %s1114_s20, %s1534_s20   ;;  %s1065_s19 = sphi %s1112_s19, %s1533_s19   ;;  %s1061_s18 = sphi %s1110_s18, %s1532_s18  }
   0x6   : > { %s1135_s24 = sadd.s32 1, %s1073_s21   ;;  %s28_s25 = sadd.s32 1, %s1069_s20 }
   0x7   : > { %s25_s26 = ssub.s32 %s1073_s21, %s1135_s24  ;;  %p35_p0 = scmp.ne.s32.totalorder %s1069_s20, %s1065_s19 }
   0x8   : > { %p26_p1 = scmp.eq.s32.totalorder %s25_s26, 0  ;;  %p36_p2 = scmp.eq.s32.totalorder %s1073_s21, 0 }
   0x9   : > { %p41_p3 = scmp.ne.s32.totalorder %s1065_s19, %s1061_s18  ;;  %p42_p4 = scmp.eq.s32.totalorder %s1131_s22, 0 }
   0xa   : > { %s1147_s27 = scalar_select %p26_p1, %s1069_s20, %s28_s25  }
   0xb   : > { %p1149_p5 = por %p36_p2, %p35_p0  ;;  %p1153_p6 = por %p42_p4, %p41_p3 }
   0xc   : > { %p149_p7 = scmp.eq.s32.totalorder %s1131_s22, 1  ;;  %p155_p8 = scmp.eq.s32.totalorder %s850_s23, 1 }
   0xd   : > { %p887_p10 = scmp.lt.s32.totalorder %s1073_s21, 2  ;;  %s187_s7 = sand.u32 1, %s1069_s20  }
   0xe   : > { %p1160_p11 = por %p149_p7, %p35_p0  ;;  %p1164_p12 = por %p155_p8, %p41_p3 }
   0xf   : > { %s873_s8 = sshll.u32 %s1073_s21, 6  ;;  %s853_s9 = sshll.u32 %s187_s7, 6 }
  0x10   : > { %s196_s12 = scalar_lea.hbm %s1508_s0, %s873_s8  ;;  %s191_s14 = scalar_lea.vmem [#allocation2], %s853_s9 }
  0x11   : > { %s197_s13 = sshll.u32 %s196_s12, 4  ;;  %s199_s15 = sshll.u32 %s191_s14, 4  ;;  %s198_s13 = int_to_ptr.hbm [resolvable:$true] %s197_s13  ;;  %s200_s15 = int_to_ptr.vmem [resolvable:$true] %s199_s15 }
  0x12   : > { %p1175_p13 = pnand %p887_p10, %p1149_p5  ;;  %p856_p0 = scmp.ge.s32.totalorder %s1073_s21, 1 }
  0x13   : > { %p207_p1 = scmp.lt.s32.totalorder %s1073_s21, 3  ;;  %s188_s17 = scalar_lea.sflag [#allocation3], %s187_s7 }
  0x14   : > { %s977_s23 = sshra.s32 %s198_s13, 4  ;;  %p981_p3 = pneg %p1175_p13  ;;  %s978_s23 = int_to_ptr.hbm [resolvable:$true] %s977_s23 }
  0x15   : > { %s979_s25 = scalar_lea.hbm %s978_s23, 64  ;;  %s984_s28 = scalar_lea.hbm %s1508_s0, 128 }
  0x16   : > { %p980_p2 = scmp.ne.s32.totalorder %s978_s23, %s979_s25  ;;  %p985_p5 = scmp.lt.s32.totalorder %s978_s23, %s1508_s0 }
  0x17   : > { %p986_p8 = scmp.lt.s32.totalorder %s984_s28, %s979_s25 }
  0x18   : > { %p982_p4 = pnand %p981_p3, %p980_p2 }
  0x19   : > { %p987_p10 = por %p986_p8, %p985_p5 }
  0x1a   : > { %p983_p7 = pneg %p982_p4 }
  0x1c   : > { %p988_p9 = pnand %p987_p10, %p983_p7 }
  0x1e   : > { %991 = shalt.err (!%p988_p9)
}
  0x1f   : > { %s1075_s7 = smov 256   ;;  %s1076_s11 = smov 16  }
  0x20   : > { %882 = dma.hbm_to_vmem [thread:$0]  (!%p1175_p13), %s198_s13, 1024, %s200_s15, %s188_s17, %s1075_s7, %s1075_s7, %s1076_s11  }
  0x21   : > { %p208_p2 = pnand %p856_p0, %p207_p1 }
  0x22   : > { %s1196_s12 = sand.u32 (!%p208_p2), 1, %s1065_s19  }
  0x23   : > { %211 = sbr.rel (%p208_p2) target bundleno = 662 (0x296), region = 40  ;;  %s857_s14 = sshll.u32 (!%p208_p2), %s1196_s12, 6 }
  0x24   : > { %s214_s23 = scalar_lea.sflag (!%p208_p2), [#allocation3], %s1196_s12  ;;  %s217_s25 = scalar_lea.vmem (!%p208_p2), [#allocation2], %s857_s14 }
  0x28   : > { %1052 = dma.done.wait (%p1153_p6), %s214_s23, 1024  }
  0x29   : > { %1054 = vsyncadd (%p1153_p6), %s214_s23, 4294966272  ;;  %v1206_v0 = vld [vmem:[%s217_s25] sm:$0xff]  ;;  %v1208_v1 = vld [vmem:[%s217_s25 + $0x8] sm:$0xff]  ;;  %v305_v28 = vlaneseq  ;;  %vm310_vm0 = vcmask 130112   ;;  %vm314_vm1 = vcmask 195712   ;;  %vm318_vm2 = vcmask 261312  }
  0x2a   : > { %v1210_v2 = vld [vmem:[%s217_s25 + $0x20] sm:$0xff]  ;;  %v269_v3 = vadd.f32 %v1208_v1, %v1206_v0  ;;  %v281_v4 = vmul.f32 %v1206_v0, %v1206_v0  ;;  %v282_v5 = vmul.f32 %v1208_v1, %v1208_v1  ;;  %v1218_v6 = vld [vmem:[%s217_s25 + $0x28] sm:$0xff]  ;;  %v1222_v8 = vld [vmem:[%s217_s25 + $0x10] sm:$0xff]  ;;  %vm333_vm3 = vcmask 1040384   ;;  %s1445_s17 = scalar_lea.vmem [#allocation5], %s857_s14  ;;  %s874_s14 = sshll.u32 %s1131_s22, 6 }
  0x2b   : > { %v275_v7 = vadd.f32 %v1218_v6, %v1210_v2  ;;  %v1224_v9 = vld [vmem:[%s217_s25 + $0x18] sm:$0xff]  ;;  %v285_v11 = vmul.f32 %v1210_v2, %v1210_v2  ;;  %v286_v12 = vmul.f32 %v1218_v6, %v1218_v6  ;;  %v283_v13 = vmul.f32 %v1222_v8, %v1222_v8  ;;  %v1236_v18 = vld [vmem:[%s217_s25 + $0x30] sm:$0xff]  ;;  %v266_v26 = vld [vmem:[%s1512_s4 + $0x8] sm:$0xff]  ;;  %s773_s8 = scalar_lea.hbm %s1513_s5, %s874_s14  ;;  %s774_s28 = sshll.u32 %s1445_s17, 4  ;;  %s775_s28 = int_to_ptr.vmem [resolvable:$true] %s774_s28 }
  0x2c   : > { %270 = vadd.xlane.f32.xlu0 %v269_v3  ;;  %v289_v10 = vadd.f32 %v282_v5, %v281_v4  ;;  %v284_v14 = vmul.f32 %v1224_v9, %v1224_v9  ;;  %v272_v15 = vadd.f32 %v1224_v9, %v1222_v8  ;;  %v1238_v19 = vld [vmem:[%s217_s25 + $0x38] sm:$0xff]  ;;  %v287_v20 = vmul.f32 %v1236_v18, %v1236_v18  ;;  %v267_v25 = vld [vmem:[%s1512_s4 + $0x10] sm:$0xff]  ;;  %v265_v27 = vld [vmem:[%s1512_s4] sm:$0xff]  ;;  %s776_s9 = sshll.u32 %s773_s8, 4  ;;  %s762_s10 = scalar_lea.sflag [#allocation4], %s1196_s12  ;;  %s777_s9 = int_to_ptr.hbm [resolvable:$true] %s776_s9 }
  0x2d   : > { %276 = vadd.xlane.f32.xlu2 %v275_v7  ;;  %v295_v16 = vadd.f32 %v286_v12, %v285_v11  ;;  %v288_v21 = vmul.f32 %v1238_v19, %v1238_v19  ;;  %v278_v22 = vadd.f32 %v1238_v19, %v1236_v18  ;;  %v268_v24 = vld [vmem:[%s1512_s4 + $0x18] sm:$0xff]  ;;  %v361_v29 = vshrl.u32 %v305_v28, 7  ;;  %v261_v4 = vld [vmem:[%s1511_s3] sm:$0xff]  ;;  %s1021_s7 = sshra.s32 %s777_s9, 4  ;;  %s1027_s29 = scalar_lea.hbm %s1513_s5, 128  ;;  %s1022_s7 = int_to_ptr.hbm [resolvable:$true] %s1021_s7 }
  0x2e   : > { %290 = vadd.xlane.f32.xlu1 %v289_v10  ;;  %v292_v17 = vadd.f32 %v284_v14, %v283_v13  ;;  %351 = vmatpush.msra.mxu0 %v268_v24  ;;  %v306_v35 = vand.u32 127, %v305_v28  ;;  %vm335_vm4 = vcmask 261120   ;;  %v1077_v3 = vmov 0   ;;  %s1023_s11 = scalar_lea.hbm %s1022_s7, 64  ;;  %p1028_p0 = scmp.lt.s32.totalorder %s1022_s7, %s1513_s5 }
  0x2f   : > { %v298_v23 = vadd.f32 %v288_v21, %v287_v20  ;;  %926 = vset.pattern.permute.xlu2 %v361_v29  ;;  %v374_v30 = vadd.s32 16, %v361_v29  ;;  %v368_v31 = vadd.s32 8, %v361_v29  ;;  %v380_v61 = vadd.s32 24, %v361_v29  ;;  %p1024_p6 = scmp.ne.s32.totalorder %s1022_s7, %s1023_s11  ;;  %p1029_p1 = scmp.lt.s32.totalorder %s1027_s29, %s1023_s11 }
  0x30   : > { %352 = vmatpush.msra.mxu0 %v267_v25  ;;  %v308_v37 = vadd.s32 4294967288, %v306_v35  ;;  %v312_v39 = vadd.s32 4294967280, %v306_v35  ;;  %v316_v43 = vadd.s32 4294967272, %v306_v35 }
  0x31   : > { %928 = vset.pattern.permute.xlu1 %v374_v30  ;;  %927 = vset.pattern.permute.xlu0 %v368_v31  ;;  %p1025_p9 = pnand %p1024_p6, %p1160_p11  ;;  %p1030_p3 = por %p1029_p1, %p1028_p0 }
  0x32   : > { %353 = vmatpush.msra.mxu0 %v266_v26 }
  0x33   : > { %p1026_p13 = pneg %p1025_p9 }
  0x34   : > { %273 = vadd.xlane.f32.xlu0 %v272_v15  ;;  %354 = vmatpush.msra.mxu0 %v265_v27 }
  0x35   : > { %296 = vadd.xlane.f32.xlu2 %v295_v16  ;;  %p1031_p4 = pnand %p1030_p3, %p1026_p13 }
  0x36   : > { %293 = vadd.xlane.f32.xlu1 %v292_v17 }
  0x3c   : > { %279 = vadd.xlane.f32.xlu0 %v278_v22 }
  0x3e   : > { %299 = vadd.xlane.f32.xlu1 %v298_v23 }
  0x9f   : > { %v271_v32 = vpop.xlane.xlu0 %270 }
  0xa0   : > { %v277_v34 = vpop.xlane.xlu2 %276  ;;  %v307_v44 = vperm.slane %v271_v32, %v306_v35 }
  0xa1   : > { %v291_v33 = vpop.xlane.xlu1 %290  ;;  %v313_v46 = vperm.slane %v277_v34, %v312_v39 }
  0xa2   : > { %v325_v45 = vperm.slane %v291_v33, %v306_v35 }
  0xa7   : > { %v274_v36 = vpop.xlane.xlu0 %273 }
  0xa8   : > { %v309_v40 = vperm.slane %v274_v36, %v308_v37  ;;  %v297_v42 = vpop.xlane.xlu2 %296  ;;  %v253_v36 = vld [vmem:[%s1509_s1] sm:$0xff] }
  0xa9   : > { %v294_v38 = vpop.xlane.xlu1 %293  ;;  %v328_v47 = vperm.slane %v297_v42, %v312_v39 }
  0xaa   : > { %v326_v41 = vperm.slane %v294_v38, %v308_v37  ;;  %v311_v49 = vsel %vm310_vm0, %v309_v40, %v307_v44 }
  0xab   : > { %v315_v55 = vsel %vm314_vm1, %v313_v46, %v311_v49 }
  0xac   : > { %v327_v50 = vsel %vm310_vm0, %v326_v41, %v325_v45 }
  0xad   : > { %v329_v54 = vsel %vm314_vm1, %v328_v47, %v327_v50 }
  0xaf   : > { %v280_v48 = vpop.xlane.xlu0 %279 }
  0xb0   : > { %v317_v51 = vperm.slane %v280_v48, %v316_v43  ;;  %v254_v48 = vld [vmem:[%s1509_s1 + $0x8] sm:$0xff] }
  0xb1   : > { %v300_v52 = vpop.xlane.xlu1 %299 }
  0xb2   : > { %v330_v53 = vperm.slane %v300_v52, %v316_v43  ;;  %v319_v56 = vsel %vm318_vm2, %v317_v51, %v315_v55 }
  0xb4   : > { %v331_v57 = vsel %vm318_vm2, %v330_v53, %v329_v54  ;;  %v258_v54 = vld [vmem:[%s1510_s2 + $0x8] sm:$0xff] }
  0xb5   : > { %v334_v58 = vsel %vm333_vm3, %v319_v56, %v331_v57 }
  0xb6   : > { %859 = vmatmul.msk.f32.vlgmr.msra.gmra.mxu0 %vm335_vm4, %v334_v58 }
 0x133   : > { %v356_v59 = vpop.f32.mrf.mxu0 }
 0x134   : > { %v359_v60 = vperm.slane %v356_v59, 0  ;;  %v384_v62 = vperm.slane %v356_v59, 1 }
 0x136   : > { %376 = vperm.xlu1 %928, %v359_v60   ;;  %370 = vperm.xlu0 %927, %v359_v60  }
 0x137   : > { %364 = vperm.xlu2 %926, %v359_v60  }
 0x13e   : > { %931 = vset.pattern.permute.xlu1 %v368_v31  ;;  %934 = vset.pattern.permute.xlu0 %v1077_v3 }
 0x13f   : > { %929 = vset.pattern.permute.xlu2 %v380_v61  ;;  %535 = vperm.xlu0 %934, %v261_v4  }
 0x146   : > { %395 = vperm.xlu1 %931, %v384_v62  }
 0x147   : > { %382 = vperm.xlu2 %929, %v359_v60  }
 0x14e   : > { %933 = vset.pattern.permute.xlu1 %v380_v61  ;;  %v255_v61 = vld [vmem:[%s1509_s1 + $0x10] sm:$0xff] }
 0x14f   : > { %930 = vset.pattern.permute.xlu2 %v361_v29 }
 0x156   : > { %407 = vperm.xlu1 %933, %v384_v62  }
 0x157   : > { %389 = vperm.xlu2 %930, %v384_v62  }
 0x15e   : > { %936 = vset.pattern.permute.xlu1 %v1077_v3 }
 0x15f   : > { %932 = vset.pattern.permute.xlu2 %v374_v30 }
 0x167   : > { %401 = vperm.xlu2 %932, %v384_v62  }
 0x16f   : > { %935 = vset.pattern.permute.xlu2 %v1077_v3 }
 0x191   : > { %v1258_v63 = vpop.permute.xlu2 %364 }
 0x192   : > { %v409_v7 = vmul.f32 %v1258_v63, %v1258_v63 }
 0x1a1   : > { %v1263_v5 = vpop.permute.xlu2 %382 }
 0x1a2   : > { %v412_v35 = vmul.f32 %v1263_v5, %v1263_v5 }
 0x1a8   : > { %v1267_v10 = vpop.permute.xlu1 %376  ;;  %v371_v13 = vpop.permute.xlu0 %370 }
 0x1a9   : > { %v410_v16 = vmul.f32 %v371_v13, %v371_v13  ;;  %v411_v25 = vmul.f32 %v1267_v10, %v1267_v10 }
 0x1b1   : > { %v390_v11 = vpop.permute.xlu2 %389 }
 0x1b2   : > { %v413_v12 = vsub.f32 %v390_v11, %v409_v7 }
 0x1b4   : > { %v417_v14 = vmax.f32 %v413_v12, 0.0 }
 0x1b6   : > { %v421_v15 = vadd.f32 1e-05, %v417_v14  ;;  %v256_v14 = vld [vmem:[%s1509_s1 + $0x18] sm:$0xff] }
 0x1b8   : > { %937 = vrsqrt.f32 %v421_v15  ;;  %v396_v17 = vpop.permute.xlu1 %395  ;;  %vm431_vm6 = vweird.f32 %v421_v15 }
 0x1b9   : > { %v414_v20 = vsub.f32 %v396_v17, %v410_v16  ;;  %v257_v17 = vld [vmem:[%s1510_s2] sm:$0xff] }
 0x1bb   : > { %v418_v21 = vmax.f32 %v414_v20, 0.0 }
 0x1bd   : > { %v422_v22 = vadd.f32 1e-05, %v418_v21 }
 0x1be   : > { %v938_v23 = vpop.eup %937 }
 0x1bf   : > { %v426_v24 = vmul.f32 %v938_v23, %v421_v15  ;;  %939 = vrsqrt.f32 %v422_v22  ;;  %vm432_vm5 = vweird.f32 %v938_v23  ;;  %vm441_vm9 = vweird.f32 %v422_v22 }
 0x1c0   : > { %vm433_vm7 = vmor %vm431_vm6, %vm432_vm5 }
 0x1c1   : > { %v427_v26 = vmul.f32 %v938_v23, %v426_v24  ;;  %v402_v27 = vpop.permute.xlu2 %401 }
 0x1c2   : > { %v415_v28 = vsub.f32 %v402_v27, %v411_v25  ;;  %v259_v25 = vld [vmem:[%s1510_s2 + $0x10] sm:$0xff] }
 0x1c3   : > { %v428_v29 = vmul.f32 0.5, %v427_v26 }
 0x1c4   : > { %v419_v30 = vmax.f32 %v415_v28, 0.0  ;;  %v262_v28 = vld [vmem:[%s1511_s3 + $0x8] sm:$0xff] }
 0x1c5   : > { %v940_v31 = vpop.eup %939  ;;  %v429_v32 = vsub.f32 1.5, %v428_v29  ;;  %v536_v29 = vpop.permute.xlu0 %535 }
 0x1c6   : > { %v436_v33 = vmul.f32 %v940_v31, %v422_v22  ;;  %v423_v34 = vadd.f32 1e-05, %v419_v30  ;;  %vm442_vm8 = vweird.f32 %v940_v31 }
 0x1c7   : > { %v430_v37 = vmul.f32 %v938_v23, %v429_v32  ;;  %vm443_vm10 = vmor %vm441_vm9, %vm442_vm8 }
 0x1c8   : > { %v437_v38 = vmul.f32 %v940_v31, %v436_v33  ;;  %941 = vrsqrt.f32 %v423_v34  ;;  %v408_v39 = vpop.permute.xlu1 %407  ;;  %vm451_vm12 = vweird.f32 %v423_v34 }
 0x1c9   : > { %v416_v40 = vsub.f32 %v408_v39, %v412_v35  ;;  %v434_v41 = vsel %vm433_vm7, %v938_v23, %v430_v37 }
 0x1ca   : > { %v438_v42 = vmul.f32 0.5, %v437_v38  ;;  %v465_v43 = vmul.f32 %v434_v41, %v253_v36 }
 0x1cb   : > { %v420_v44 = vmax.f32 %v416_v40, 0.0 }
 0x1cc   : > { %v439_v45 = vsub.f32 1.5, %v438_v42  ;;  %479 = vperm.xlu0 %934, %v465_v43   ;;  %v469_v16 = vmul.f32 %v465_v43, %v1258_v63  ;;  %v260_v63 = vld [vmem:[%s1510_s2 + $0x18] sm:$0xff] }
 0x1cd   : > { %v424_v46 = vadd.f32 1e-05, %v420_v44 }
 0x1ce   : > { %v942_v47 = vpop.eup %941  ;;  %v440_v49 = vmul.f32 %v940_v31, %v439_v45  ;;  %v473_v22 = vsub.f32 %v257_v17, %v469_v16 }
 0x1cf   : > { %v446_v50 = vmul.f32 %v942_v47, %v423_v34  ;;  %943 = vrsqrt.f32 %v424_v46  ;;  %vm452_vm11 = vweird.f32 %v942_v47  ;;  %vm461_vm15 = vweird.f32 %v424_v46 }
 0x1d0   : > { %v444_v51 = vsel %vm443_vm10, %v940_v31, %v440_v49  ;;  %vm453_vm13 = vmor %vm451_vm12, %vm452_vm11 }
 0x1d1   : > { %v447_v52 = vmul.f32 %v942_v47, %v446_v50  ;;  %v466_v53 = vmul.f32 %v444_v51, %v254_v48 }
 0x1d3   : > { %v448_v55 = vmul.f32 0.5, %v447_v52  ;;  %484 = vperm.xlu2 %935, %v466_v53   ;;  %v470_v56 = vmul.f32 %v466_v53, %v371_v13  ;;  %v264_v13 = vld [vmem:[%s1511_s3 + $0x18] sm:$0xff] }
 0x1d5   : > { %v944_v57 = vpop.eup %943  ;;  %v449_v58 = vsub.f32 1.5, %v448_v55  ;;  %v474_v59 = vsub.f32 %v258_v54, %v470_v56 }
 0x1d6   : > { %v456_v60 = vmul.f32 %v944_v57, %v424_v46  ;;  %vm462_vm14 = vweird.f32 %v944_v57 }
 0x1d7   : > { %512 = vperm.xlu0 %934, %v474_v59   ;;  %v450_v62 = vmul.f32 %v942_v47, %v449_v58  ;;  %vm463_vm0 = vmor %vm461_vm15, %vm462_vm14 }
 0x1d8   : > { %v457_v3 = vmul.f32 %v944_v57, %v456_v60 }
 0x1d9   : > { %v454_v4 = vsel %vm453_vm13, %v942_v47, %v450_v62 }
 0x1da   : > { %v458_v7 = vmul.f32 0.5, %v457_v3  ;;  %v467_v11 = vmul.f32 %v454_v4, %v255_v61 }
 0x1dc   : > { %v459_v12 = vsub.f32 1.5, %v458_v7  ;;  %489 = vperm.xlu1 %936, %v467_v11   ;;  %v471_v23 = vmul.f32 %v467_v11, %v1267_v10 }
 0x1de   : > { %v460_v15 = vmul.f32 %v944_v57, %v459_v12  ;;  %v475_v26 = vsub.f32 %v259_v25, %v471_v23 }
 0x1df   : > { %550 = vperm.xlu0 %934, %v264_v13  }
 0x1e0   : > { %v464_v20 = vsel %vm463_vm0, %v944_v57, %v460_v15 }
 0x1e1   : > { %v468_v21 = vmul.f32 %v464_v20, %v256_v14 }
 0x1e3   : > { %494 = vperm.xlu2 %935, %v468_v21   ;;  %v472_v24 = vmul.f32 %v468_v21, %v1263_v5  ;;  %v263_v5 = vld [vmem:[%s1511_s3 + $0x10] sm:$0xff] }
 0x1e4   : > { %507 = vperm.xlu1 %936, %v473_v22  }
 0x1e5   : > { %v476_v27 = vsub.f32 %v260_v63, %v472_v24 }
 0x1eb   : > { %517 = vperm.xlu2 %935, %v475_v26  }
 0x1ec   : > { %522 = vperm.xlu1 %936, %v476_v27  }
 0x1f3   : > { %540 = vperm.xlu2 %935, %v262_v28  }
 0x1f4   : > { %545 = vperm.xlu1 %936, %v263_v5  }
 0x22d   : > { %v485_v10 = vpop.permute.xlu2 %484 }
 0x22e   : > { %v499_v34 = vmul.f32 %v485_v10, %v1222_v8  ;;  %v500_v35 = vmul.f32 %v485_v10, %v1224_v9 }
 0x23d   : > { %v495_v30 = vpop.permute.xlu2 %494 }
 0x23e   : > { %v480_v31 = vpop.permute.xlu0 %479  ;;  %v503_v55 = vmul.f32 %v495_v30, %v1236_v18  ;;  %v504_v56 = vmul.f32 %v495_v30, %v1238_v19 }
 0x23f   : > { %v497_v44 = vmul.f32 %v480_v31, %v1206_v0  ;;  %v498_v45 = vmul.f32 %v480_v31, %v1208_v1 }
 0x245   : > { %v1309_v32 = vpop.permute.xlu2 %517 }
 0x249   : > { %v513_v33 = vpop.permute.xlu0 %512 }
 0x24a   : > { %v527_v36 = vadd.f32 %v513_v33, %v499_v34  ;;  %v528_v37 = vadd.f32 %v513_v33, %v500_v35 }
 0x24d   : > { %v541_v38 = vpop.permute.xlu2 %540 }
 0x24e   : > { %v490_v39 = vpop.permute.xlu1 %489  ;;  %v555_v40 = vmul.f32 %v541_v38, %v527_v36  ;;  %v556_v41 = vmul.f32 %v541_v38, %v528_v37 }
 0x24f   : > { %v501_v4 = vmul.f32 %v490_v39, %v1210_v2  ;;  %v502_v5 = vmul.f32 %v490_v39, %v1218_v6 }
 0x250   : > { %v862_v42 = vmul.f32 -1.442695, %v555_v40  ;;  %v863_v43 = vmul.f32 -1.442695, %v556_v41 }
 0x251   : > { %v551_v62 = vpop.permute.xlu0 %550  ;;  %v529_v22 = vadd.f32 %v1309_v32, %v501_v4 }
 0x252   : > { %945 = vpow2.f32 %v862_v42  ;;  %v530_v42 = vadd.f32 %v1309_v32, %v502_v5 }
 0x253   : > { %947 = vpow2.f32 %v863_v43 }
 0x256   : > { %v508_v46 = vpop.permute.xlu1 %507 }
 0x257   : > { %v525_v47 = vadd.f32 %v508_v46, %v497_v44  ;;  %v526_v48 = vadd.f32 %v508_v46, %v498_v45 }
 0x258   : > { %v946_v49 = vpop.eup %945 }
 0x259   : > { %v948_v50 = vpop.eup %947  ;;  %v1315_v51 = vadd.f32 1.0, %v946_v49  ;;  %v553_v52 = vmul.f32 %v536_v29, %v525_v47  ;;  %v554_v53 = vmul.f32 %v536_v29, %v526_v48 }
 0x25a   : > { %v1317_v54 = vadd.f32 1.0, %v948_v50 }
 0x25b   : > { %949 = vrcp.f32 %v1315_v51  ;;  %v860_v57 = vmul.f32 -1.442695, %v553_v52  ;;  %v861_v58 = vmul.f32 -1.442695, %v554_v53  ;;  %v634_v29 = vand.u32 2147483648, %v1315_v51 }
 0x25c   : > { %951 = vrcp.f32 %v1317_v54  ;;  %vm628_vm3 = vweird.f32 %v1315_v51  ;;  %v632_v33 = vand.u32 2147483647, %v1315_v51  ;;  %v649_v34 = vand.u32 2147483648, %v1317_v54 }
 0x25d   : > { %953 = vpow2.f32 %v860_v57  ;;  %vm643_vm5 = vweird.f32 %v1317_v54  ;;  %v647_v38 = vand.u32 2147483647, %v1317_v54  ;;  %v635_v44 = vor.u32 1.1754944e-38, %v634_v29 }
 0x25e   : > { %v523_v59 = vpop.permute.xlu1 %522  ;;  %955 = vpow2.f32 %v861_v58  ;;  %vm633_vm7 = vcmp.eq.f32.partialorder %v632_v33, 8.507059e+37  ;;  %v650_v47 = vor.u32 1.1754944e-38, %v649_v34 }
 0x25f   : > { %v531_v60 = vadd.f32 %v523_v59, %v503_v55  ;;  %v532_v61 = vadd.f32 %v523_v59, %v504_v56  ;;  %vm648_vm8 = vcmp.eq.f32.partialorder %v647_v38, 8.507059e+37 }
 0x261   : > { %v950_v3 = vpop.eup %949  ;;  %v559_v7 = vmul.f32 %v551_v62, %v531_v60  ;;  %v560_v11 = vmul.f32 %v551_v62, %v532_v61 }
 0x262   : > { %v952_v12 = vpop.eup %951  ;;  %v624_v13 = vmul.f32 %v950_v3, %v1315_v51  ;;  %vm629_vm1 = vweird.f32 %v950_v3 }
 0x263   : > { %v639_v14 = vmul.f32 %v952_v12, %v1317_v54  ;;  %v866_v15 = vmul.f32 -1.442695, %v559_v7  ;;  %v867_v16 = vmul.f32 -1.442695, %v560_v11  ;;  %v954_v20 = vpop.eup %953  ;;  %vm644_vm2 = vweird.f32 %v952_v12  ;;  %vm1338_vm4 = vmor %vm628_vm3, %vm629_vm1 }
 0x264   : > { %v625_v17 = vsub.f32 1.0, %v624_v13  ;;  %v956_v23 = vpop.eup %955  ;;  %v1327_v25 = vadd.f32 1.0, %v954_v20  ;;  %vm1346_vm6 = vmor %vm643_vm5, %vm644_vm2 }
 0x265   : > { %v640_v21 = vsub.f32 1.0, %v639_v14  ;;  %957 = vpow2.f32 %v866_v15  ;;  %v1329_v27 = vadd.f32 1.0, %v956_v23 }
 0x266   : > { %v626_v24 = vmul.f32 %v950_v3, %v625_v17  ;;  %959 = vpow2.f32 %v867_v16  ;;  %v546_v63 = vpop.permute.xlu1 %545  ;;  %v604_v53 = vand.u32 2147483648, %v1327_v25  ;;  %v602_v55 = vand.u32 2147483647, %v1327_v25 }
 0x267   : > { %v641_v26 = vmul.f32 %v952_v12, %v640_v21  ;;  %v557_v28 = vmul.f32 %v546_v63, %v529_v22  ;;  %961 = vrcp.f32 %v1327_v25  ;;  %v558_v49 = vmul.f32 %v546_v63, %v530_v42 }
 0x268   : > { %v627_v10 = vadd.f32 %v950_v3, %v626_v24  ;;  %963 = vrcp.f32 %v1329_v27  ;;  %vm598_vm11 = vweird.f32 %v1327_v25  ;;  %v617_v4 = vand.u32 2147483647, %v1329_v27 }
 0x269   : > { %v642_v30 = vadd.f32 %v952_v12, %v641_v26  ;;  %v864_v35 = vmul.f32 -1.442695, %v557_v28  ;;  %v865_v57 = vmul.f32 -1.442695, %v558_v49  ;;  %v619_v7 = vand.u32 2147483648, %v1329_v27 }
 0x26a   : > { %v631_v39 = vsel %vm1338_vm4, %v950_v3, %v627_v10  ;;  %v605_v3 = vor.u32 1.1754944e-38, %v604_v53  ;;  %vm1379_vm12 = vcmp.eq.f32.partialorder %v602_v55, 8.507059e+37  ;;  %vm613_vm1 = vweird.f32 %v1329_v27 }
 0x26b   : > { %v958_v31 = vpop.eup %957  ;;  %v646_v45 = vsel %vm1346_vm6, %v952_v12, %v642_v30  ;;  %965 = vpow2.f32 %v864_v35  ;;  %v636_v51 = vsel %vm633_vm7, %v635_v44, %v631_v39  ;;  %v620_v13 = vor.u32 1.1754944e-38, %v619_v7 }
 0x26c   : > { %v960_v36 = vpop.eup %959  ;;  %v1350_v41 = vadd.f32 1.0, %v958_v31  ;;  %v651_v32 = vsel %vm648_vm8, %v650_v47, %v646_v45  ;;  %v723_v54 = vmul.f32 %v636_v51, %v1222_v8  ;;  %vm715_vm9 = vcmp.gt.f32.partialorder %v636_v51, 0.5 }
 0x26d   : > { %v1353_v43 = vpop.eup %961  ;;  %v1357_v46 = vadd.f32 1.0, %v960_v36  ;;  %v724_v59 = vmul.f32 %v651_v32, %v1224_v9  ;;  %vm716_vm10 = vcmp.gt.f32.partialorder %v651_v32, 0.5 }
 0x26e   : > { %v594_v48 = vmul.f32 %v1353_v43, %v1327_v25  ;;  %v1361_v50 = vpop.eup %963  ;;  %967 = vrcp.f32 %v1350_v41  ;;  %v731_v12 = vsel %vm715_vm9, %v1222_v8, %v723_v54  ;;  %v739_v17 = vsel %vm715_vm9, 0.0, %v723_v54 }
 0x26f   : > { %969 = vrcp.f32 %v1357_v46  ;;  %v609_v56 = vmul.f32 %v1361_v50, %v1329_v27  ;;  %v732_v16 = vsel %vm716_vm10, %v1224_v9, %v724_v59  ;;  %v740_v20 = vsel %vm716_vm10, 0.0, %v724_v59 }
 0x270   : > { %v595_v52 = vsub.f32 1.0, %v594_v48  ;;  %971 = vpow2.f32 %v865_v57  ;;  %vm599_vm13 = vweird.f32 %v1353_v43  ;;  %v692_v23 = vand.u32 2147483647, %v1350_v41 }
 0x271   : > { %v966_v58 = vpop.eup %965  ;;  %v610_v14 = vsub.f32 1.0, %v609_v56  ;;  %vm614_vm14 = vweird.f32 %v1361_v50  ;;  %v694_v24 = vand.u32 2147483648, %v1350_v41  ;;  %v707_v9 = vand.u32 2147483647, %v1357_v46  ;;  %vm1400_vm0 = vmor %vm598_vm11, %vm599_vm13 }
 0x272   : > { %v596_v60 = vmul.f32 %v1353_v43, %v595_v52  ;;  %v1372_v61 = vadd.f32 1.0, %v966_v58  ;;  %v709_v10 = vand.u32 2147483648, %v1357_v46  ;;  %vm688_vm2 = vweird.f32 %v1350_v41  ;;  %vm1428_vm13 = vmor %vm613_vm1, %vm614_vm14 }
 0x273   : > { %v611_v28 = vmul.f32 %v1361_v50, %v610_v14  ;;  %vm693_vm4 = vcmp.eq.f32.partialorder %v692_v23, 8.507059e+37  ;;  %vm703_vm5 = vweird.f32 %v1357_v46  ;;  %v695_v25 = vor.u32 1.1754944e-38, %v694_v24 }
 0x274   : > { %v968_v62 = vpop.eup %967  ;;  %973 = vrcp.f32 %v1372_v61  ;;  %v597_v8 = vadd.f32 %v1353_v43, %v596_v60  ;;  %vm708_vm8 = vcmp.eq.f32.partialorder %v707_v9, 8.507059e+37  ;;  %v710_v40 = vor.u32 1.1754944e-38, %v709_v10 }
 0x275   : > { %v970_v11 = vpop.eup %969  ;;  %v684_v15 = vmul.f32 %v968_v62, %v1350_v41  ;;  %vm689_vm15 = vweird.f32 %v968_v62  ;;  %v612_v38 = vadd.f32 %v1361_v50, %v611_v28  ;;  %vm658_vm10 = vweird.f32 %v1372_v61 }
 0x276   : > { %v699_v21 = vmul.f32 %v970_v11, %v1357_v46  ;;  %v972_v26 = vpop.eup %971  ;;  %vm704_vm3 = vweird.f32 %v970_v11  ;;  %v601_v34 = vsel %vm1400_vm0, %v1353_v43, %v597_v8  ;;  %vm690_vm6 = vmor %vm688_vm2, %vm689_vm15  ;;  %v664_v49 = vand.u32 2147483648, %v1372_v61 }
 0x277   : > { %v685_v22 = vsub.f32 1.0, %v684_v15  ;;  %v1406_v31 = vadd.f32 1.0, %v972_v26  ;;  %vm705_vm7 = vmor %vm703_vm5, %vm704_vm3  ;;  %v606_v41 = vsel %vm1379_vm12, %v605_v3, %v601_v34  ;;  %v662_v52 = vand.u32 2147483647, %v1372_v61 }
 0x278   : > { %v700_v63 = vsub.f32 1.0, %v699_v21  ;;  %vm1438_vm15 = vcmp.eq.f32.partialorder %v617_v4, 8.507059e+37  ;;  %vm713_vm0 = vcmp.gt.f32.partialorder %v606_v41, 0.5 }
 0x279   : > { %v686_v5 = vmul.f32 %v968_v62, %v685_v22  ;;  %975 = vrcp.f32 %v1406_v31  ;;  %vm663_vm1 = vcmp.eq.f32.partialorder %v662_v52, 8.507059e+37  ;;  %v677_v15 = vand.u32 2147483647, %v1406_v31 }
 0x27a   : > { %v701_v30 = vmul.f32 %v970_v11, %v700_v63  ;;  %v974_v33 = vpop.eup %973 }
 0x27b   : > { %v687_v35 = vadd.f32 %v968_v62, %v686_v5  ;;  %v654_v37 = vmul.f32 %v974_v33, %v1372_v61  ;;  %vm659_vm12 = vweird.f32 %v974_v33 }
 0x27c   : > { %v702_v36 = vadd.f32 %v970_v11, %v701_v30  ;;  %vm660_vm14 = vmor %vm658_vm10, %vm659_vm12 }
 0x27d   : > { %v691_v39 = vsel %vm690_vm6, %v968_v62, %v687_v35  ;;  %v655_v44 = vsub.f32 1.0, %v654_v37  ;;  %vm678_vm6 = vcmp.eq.f32.partialorder %v677_v15, 8.507059e+37 }
 0x27e   : > { %v696_v42 = vsel %vm693_vm4, %v695_v25, %v691_v39  ;;  %v706_v43 = vsel %vm705_vm7, %v970_v11, %v702_v36  ;;  %v721_v11 = vmul.f32 %v606_v41, %v1206_v0  ;;  %vm673_vm4 = vweird.f32 %v1406_v31 }
 0x27f   : > { %v711_v45 = vsel %vm708_vm8, %v710_v40, %v706_v43  ;;  %vm719_vm9 = vcmp.gt.f32.partialorder %v696_v42, 0.5  ;;  %v727_v46 = vmul.f32 %v696_v42, %v1236_v18  ;;  %v656_v48 = vmul.f32 %v974_v33, %v655_v44  ;;  %v976_v53 = vpop.eup %975 }
 0x280   : > { %vm720_vm11 = vcmp.gt.f32.partialorder %v711_v45, 0.5  ;;  %v728_v47 = vmul.f32 %v711_v45, %v1238_v19  ;;  %v669_v62 = vmul.f32 %v976_v53, %v1406_v31  ;;  %vm674_vm2 = vweird.f32 %v976_v53 }
 0x281   : > { %v735_v51 = vsel %vm719_vm9, %v1236_v18, %v727_v46  ;;  %v743_v32 = vsel %vm719_vm9, 0.0, %v727_v46  ;;  %v657_v60 = vadd.f32 %v974_v33, %v656_v48  ;;  %v729_v27 = vsel %vm713_vm0, %v1206_v0, %v721_v11  ;;  %vm675_vm5 = vmor %vm673_vm4, %vm674_vm2 }
 0x282   : > { %v736_v54 = vsel %vm720_vm11, %v1238_v19, %v728_v47  ;;  %v744_v55 = vsel %vm720_vm11, 0.0, %v728_v47  ;;  %v747_v56 = vadd.f32 %v743_v32, %v731_v12  ;;  %v755_v57 = vadd.f32 %v739_v17, %v735_v51 }
 0x283   : > { %v748_v18 = vadd.f32 %v744_v55, %v732_v16  ;;  %v756_v59 = vadd.f32 %v740_v20, %v736_v54  ;;  %v616_v19 = vsel %vm1428_vm13, %v1361_v50, %v612_v38  ;;  %v665_v50 = vor.u32 1.1754944e-38, %v664_v49 }
 0x284   : > { %751 = vst [vmem:[%s1445_s17 + $0x10] sm:$0xff] %v747_v56  ;;  %v661_v4 = vsel %vm660_vm14, %v974_v33, %v657_v60  ;;  %v670_v12 = vsub.f32 1.0, %v669_v62  ;;  %v679_v16 = vand.u32 2147483648, %v1406_v31  ;;  %v621_v20 = vsel %vm1438_vm15, %v620_v13, %v616_v19 }
 0x285   : > { %752 = vst [vmem:[%s1445_s17 + $0x18] sm:$0xff] %v748_v18  ;;  %v666_v14 = vsel %vm663_vm1, %v665_v50, %v661_v4  ;;  %v737_v7 = vsel %vm713_vm0, 0.0, %v721_v11  ;;  %v722_v0 = vmul.f32 %v621_v20, %v1208_v1  ;;  %vm714_vm7 = vcmp.gt.f32.partialorder %v621_v20, 0.5 }
 0x286   : > { %759 = vst [vmem:[%s1445_s17 + $0x30] sm:$0xff] %v755_v57  ;;  %v671_v17 = vmul.f32 %v976_v53, %v670_v12  ;;  %vm717_vm3 = vcmp.gt.f32.partialorder %v666_v14, 0.5  ;;  %v725_v61 = vmul.f32 %v666_v14, %v1210_v2  ;;  %v680_v23 = vor.u32 1.1754944e-38, %v679_v16 }
 0x287   : > { %760 = vst [vmem:[%s1445_s17 + $0x38] sm:$0xff] %v756_v59  ;;  %v730_v28 = vsel %vm714_vm7, %v1208_v1, %v722_v0  ;;  %v738_v5 = vsel %vm714_vm7, 0.0, %v722_v0 }
 0x288   : > { %v672_v21 = vadd.f32 %v976_v53, %v671_v17  ;;  %v733_v8 = vsel %vm717_vm3, %v1210_v2, %v725_v61  ;;  %v741_v22 = vsel %vm717_vm3, 0.0, %v725_v61 }
 0x289   : > { %v745_v24 = vadd.f32 %v741_v22, %v729_v27  ;;  %v753_v63 = vadd.f32 %v737_v7, %v733_v8 }
 0x28a   : > { %v676_v9 = vsel %vm675_vm5, %v976_v53, %v672_v21 }
 0x28b   : > { %v681_v26 = vsel %vm678_vm6, %v680_v23, %v676_v9  ;;  %749 = vst [vmem:[%s1445_s17] sm:$0xff] %v745_v24 }
 0x28c   : > { %vm718_vm8 = vcmp.gt.f32.partialorder %v681_v26, 0.5  ;;  %v726_v2 = vmul.f32 %v681_v26, %v1218_v6  ;;  %757 = vst [vmem:[%s1445_s17 + $0x20] sm:$0xff] %v753_v63 }
 0x28e   : > { %v734_v10 = vsel %vm718_vm8, %v1218_v6, %v726_v2  ;;  %v742_v29 = vsel %vm718_vm8, 0.0, %v726_v2 }
 0x28f   : > { %v746_v30 = vadd.f32 %v742_v29, %v730_v28  ;;  %v754_v31 = vadd.f32 %v738_v5, %v734_v10 }
 0x291   : > { %750 = vst [vmem:[%s1445_s17 + $0x8] sm:$0xff] %v746_v30 }
 0x292   : > { %758 = vst [vmem:[%s1445_s17 + $0x28] sm:$0xff] %v754_v31 }
 0x293   : > { %1034 = shalt.err (!%p1031_p4)
}
 0x294   : > { %s1078_s12 = smov 256   ;;  %s1079_s16 = smov 16  }
 0x295   : > { %877 = dma.vmem_to_hbm [thread:$0]  (%p1160_p11), %s775_s28, 1024, %s777_s9, %s762_s10, %s1078_s12, %s1078_s12, %s1079_s16  }
 0x296 PF: > { %s791_s17 = sand.u32 1, %s1061_s18   ;;  %p1531_p7 = scmp.ge.s32.totalorder %s1073_s21, 2 }
 0x297   : > { %s792_s14 = scalar_lea.sflag [#allocation4], %s791_s17 }
 0x298   : > { %p884_p5 = pnand %p1531_p7, %p1164_p12 }
 0x29a   : > { %p885_p8 = pneg %p884_p5 }
 0x29c   : > { %1056 = dma.done.wait (%p885_p8), %s792_s14, 1024  }
 0x29d   : > { %1058 = vsyncadd (%p885_p8), %s792_s14, 4294966272  ;;  %p18_p10 = scmp.ge.s32.totalorder %s1135_s24, 4   ;;  %s1532_s18 = smov %s1065_s19 }
 0x29e   : > { %s1533_s19 = smov %s1069_s20  ;;  %s1534_s20 = smov %s1147_s27 }
 0x29f   : > { %s1535_s21 = smov %s1135_s24  ;;  %20 = sbr.rel (!%p18_p10) target bundleno = 5 (0x5), region = 85 }
 0x2a4   :  { %798 = vsyncpa [#allocation3], 1 }
 0x2a5   :  { %800 = vsyncpa [#allocation3 + $0x1], 1 }
 0x2a6   :  { %801 = vsyncpa [#allocation4], 1 }
 0x2a7   :  { %803 = vsyncpa [#allocation4 + $0x1], 1 }

</bundles_post_ra>
